<compile_context>
chip_gen: v7x
topology: tpu7x:2x2x1
jax: 0.10.0
libtpu: 0.0.40
codegen_flags: <defaults>
</compile_context>

<pallas_src>
import functools

import jax
import jax.numpy as jnp
from jax.experimental import pallas as pl
from jax.experimental.pallas import tpu as pltpu


def _round_up(x, m):
    return (x + m - 1) // m * m


def critic_kernel(s_ref, w1_ref, b1_ref, w2_ref, b2_ref, o_ref):
    # s_ref : (obs_p, TB)   streamed input tile, batch along lanes
    # w1_ref: (256, obs_p)  layer-1 weight, PyTorch (out, in) layout, resident
    # b1_ref: (256, 1)      layer-1 bias column, resident
    # w2_ref: (256, 1)      layer-2 weight column, resident
    # b2_ref: (1,)          layer-2 bias scalar, SMEM
    # o_ref : (1, TB)       lane-dense value row for this batch tile
    h = jnp.tanh(
        jnp.dot(w1_ref[...], s_ref[...], preferred_element_type=jnp.float32)
        + b1_ref[...]
    )  # (256, TB) float32
    v = jnp.sum(h * w2_ref[...], axis=0, keepdims=True) + b2_ref[0]  # (1, TB)
    o_ref[...] = v.astype(o_ref.dtype)


@functools.partial(jax.jit, static_argnames=("block_batch", "use_bf16"))
def critic_forward(s, w1, b1, w2, b2, *, block_batch=1024, use_bf16=False):
    """Forward pass of the Critic MLP.

    s : (B, obs_dims) float32
    w1: (256, obs_dims), b1: (256,), w2: (1, 256), b2: (1,)  (PyTorch layouts)
    Returns (B, 1) float32.
    """
    B, obs = s.shape
    hidden = w1.shape[0]
    assert block_batch % 128 == 0
    assert hidden % 8 == 0

    # Batch tile along lanes; pad obs to a sublane multiple, batch to a
    # tile multiple (padding columns are zero and get sliced off at the end).
    TB = min(block_batch, _round_up(B, 128))
    Bp = _round_up(B, TB)
    num_tiles = Bp // TB
    obs_p = _round_up(obs, 8)

    s_t = jnp.pad(jnp.transpose(s), ((0, obs_p - obs), (0, Bp - B)))
    w1_p = jnp.pad(w1, ((0, 0), (0, obs_p - obs)))
    if use_bf16:  # halve HBM traffic of the streamed operand (v6e / v7x)
        s_t = s_t.astype(jnp.bfloat16)
        w1_p = w1_p.astype(jnp.bfloat16)

    b1_col = b1.reshape(hidden, 1).astype(jnp.float32)
    w2_col = w2.reshape(hidden, 1).astype(jnp.float32)
    b2_s = b2.reshape(1).astype(jnp.float32)

    out = pl.pallas_call(
        critic_kernel,
        out_shape=jax.ShapeDtypeStruct((1, Bp), jnp.float32),
        grid=(num_tiles,),
        in_specs=[
            pl.BlockSpec((obs_p, TB), lambda i: (0, i)),       # streamed s tile
            pl.BlockSpec((hidden, obs_p), lambda i: (0, 0)),   # W1 resident
            pl.BlockSpec((hidden, 1), lambda i: (0, 0)),       # b1 resident
            pl.BlockSpec((hidden, 1), lambda i: (0, 0)),       # w2 resident
            pl.BlockSpec((1,), lambda i: (0,),
                         memory_space=pltpu.MemorySpace.SMEM),  # b2 scalar
        ],
        out_specs=pl.BlockSpec((1, TB), lambda i: (0, i)),      # lane-dense out
        compiler_params=pltpu.CompilerParams(
            dimension_semantics=("parallel",),  # shard tiles across TCs (v7x)
            vmem_limit_bytes=32 * 1024 * 1024,
        ),
    )(s_t, w1_p, b1_col, w2_col, b2_s)

    return out.reshape(Bp, 1)[:B]


def init_params(key, obs_dims, hidden=256):
    """Deterministic init mimicking torch.nn.Linear default (uniform +/- 1/sqrt(fan_in)),
    stored in PyTorch layouts: w = (out, in), b = (out,)."""
    k1, k2, k3, k4 = jax.random.split(key, 4)
    bound1 = 1.0 / jnp.sqrt(jnp.float32(obs_dims))
    bound2 = 1.0 / jnp.sqrt(jnp.float32(hidden))
    w1 = jax.random.uniform(k1, (hidden, obs_dims), jnp.float32, -bound1, bound1)
    b1 = jax.random.uniform(k2, (hidden,), jnp.float32, -bound1, bound1)
    w2 = jax.random.uniform(k3, (1, hidden), jnp.float32, -bound2, bound2)
    b2 = jax.random.uniform(k4, (1,), jnp.float32, -bound2, bound2)
    return w1, b1, w2, b2


if __name__ == "__main__":
    key = jax.random.PRNGKey(0)
    k_params, k_input = jax.random.split(key)

    batch, obs_dims = 8, 32
    w1, b1, w2, b2 = init_params(k_params, obs_dims)
    s = jax.random.normal(k_input, (batch, obs_dims), jnp.float32)

    # Pure-JAX reference in full f32 precision (PyTorch semantics:
    # y = tanh(s @ W1.T + b1) @ W2.T + b2).
    hp = jax.lax.Precision.HIGHEST
    hid = jnp.tanh(jnp.dot(s, w1.T, precision=hp) + b1)
    ref = jnp.dot(hid, w2.T, precision=hp) + b2

    # f32 path (exact; use on v5e or when bit-accuracy matters).
    out = jax.block_until_ready(critic_forward(s, w1, b1, w2, b2))
    assert out.shape == (batch, 1)
    assert jnp.allclose(out, ref, atol=1e-5, rtol=1e-5)

    # bf16 streaming path (memory-bound optimization for v6e / v7x).
    out_bf16 = jax.block_until_ready(
        critic_forward(s, w1, b1, w2, b2, use_bf16=True))
    assert out_bf16.shape == (batch, 1)
    assert jnp.allclose(out_bf16, ref, atol=5e-2, rtol=5e-2)

    print("KERNEL_OK")
</pallas_src>

<mosaic_0001>
module attributes {stable_mosaic.version = 11 : i64} {
  func.func @critic_kernel(%arg0: i32, %arg1: memref<32x128xf32, #tpu.memory_space<vmem>>, %arg2: memref<256x32xf32, #tpu.memory_space<vmem>>, %arg3: memref<256x1xf32, #tpu.memory_space<vmem>>, %arg4: memref<256x1xf32, #tpu.memory_space<vmem>>, %arg5: memref<1xf32, #tpu.memory_space<smem>>, %arg6: memref<1x128xf32, #tpu.memory_space<vmem>>) attributes {dimension_semantics = [#tpu.dimension_semantics<parallel>], iteration_bounds = array<i64: 1>, scalar_prefetch = 0 : i64, scratch_operands = 0 : i64, tpu.core_type = #tpu.core_type<tc>, window_params = [{transform_indices = @transform_0, window_bounds = array<i64: 32, 128>}, {pipeline_mode = #tpu.pipeline_mode<synchronous>, transform_indices = @transform_1, window_bounds = array<i64: 256, 32>}, {pipeline_mode = #tpu.pipeline_mode<synchronous>, transform_indices = @transform_2, window_bounds = array<i64: 256, 1>}, {pipeline_mode = #tpu.pipeline_mode<synchronous>, transform_indices = @transform_3, window_bounds = array<i64: 256, 1>}, {transform_indices = @transform_4, window_bounds = array<i64: 1>}, {transform_indices = @transform_5, window_bounds = array<i64: 1, 128>}]} {
    %c0 = arith.constant 0 : index
    %c0_0 = arith.constant 0 : index
    %0 = vector.load %arg2[%c0, %c0_0] : memref<256x32xf32, #tpu.memory_space<vmem>>, vector<256x32xf32>
    %c0_1 = arith.constant 0 : index
    %c0_2 = arith.constant 0 : index
    %1 = vector.load %arg1[%c0_1, %c0_2] : memref<32x128xf32, #tpu.memory_space<vmem>>, vector<32x128xf32>
    %cst = arith.constant dense<0.000000e+00> : vector<256x128xf32>
    %2 = tpu.matmul %0, %1, %cst {dimension_numbers = #tpu.dot_dimension_numbers<[1], [0], [0], [1], [0, 0, 1, 1], [], []>} : vector<256x32xf32>, vector<32x128xf32>, vector<256x128xf32> -> vector<256x128xf32>
    %c0_3 = arith.constant 0 : index
    %c0_4 = arith.constant 0 : index
    %3 = vector.load %arg3[%c0_3, %c0_4] : memref<256x1xf32, #tpu.memory_space<vmem>>, vector<256x1xf32>
    %4 = vector.broadcast %3 : vector<256x1xf32> to vector<256x128xf32>
    %5 = arith.addf %2, %4 : vector<256x128xf32>
    %6 = math.tanh %5 : vector<256x128xf32>
    %c0_5 = arith.constant 0 : index
    %c0_6 = arith.constant 0 : index
    %7 = vector.load %arg4[%c0_5, %c0_6] : memref<256x1xf32, #tpu.memory_space<vmem>>, vector<256x1xf32>
    %8 = vector.broadcast %7 : vector<256x1xf32> to vector<256x128xf32>
    %9 = arith.mulf %6, %8 : vector<256x128xf32>
    %cst_7 = arith.constant dense<0.000000e+00> : vector<128xf32>
    %10 = vector.multi_reduction <add>, %9, %cst_7 [0] : vector<256x128xf32> to vector<128xf32>
    %11 = vector.shape_cast %10 : vector<128xf32> to vector<1x128xf32>
    %c0_8 = arith.constant 0 : index
    %12 = memref.load %arg5[%c0_8] : memref<1xf32, #tpu.memory_space<smem>>
    %13 = vector.broadcast %12 : f32 to vector<1x128xf32>
    %14 = arith.addf %11, %13 : vector<1x128xf32>
    %c0_9 = arith.constant 0 : index
    %c0_10 = arith.constant 0 : index
    %15 = vector.load %arg6[%c0_9, %c0_10] : memref<1x128xf32, #tpu.memory_space<vmem>>, vector<1x128xf32>
    tpu.vector_store %arg6[%c0_9, %c0_10], %14 {strides = array<i32>} : memref<1x128xf32, #tpu.memory_space<vmem>>, vector<1x128xf32>,
    return
  }
  func.func @transform_0(%arg0: i32) -> (i32, i32) {
    %c0_i32 = arith.constant 0 : i32
    %c0_i32_0 = arith.constant 0 : i32
    return %c0_i32, %arg0 : i32, i32
  }
  func.func @transform_1(%arg0: i32) -> (i32, i32) {
    %c0_i32 = arith.constant 0 : i32
    %c0_i32_0 = arith.constant 0 : i32
    %c0_i32_1 = arith.constant 0 : i32
    return %c0_i32, %c0_i32_0 : i32, i32
  }
  func.func @transform_2(%arg0: i32) -> (i32, i32) {
    %c0_i32 = arith.constant 0 : i32
    %c0_i32_0 = arith.constant 0 : i32
    %c0_i32_1 = arith.constant 0 : i32
    return %c0_i32, %c0_i32_0 : i32, i32
  }
  func.func @transform_3(%arg0: i32) -> (i32, i32) {
    %c0_i32 = arith.constant 0 : i32
    %c0_i32_0 = arith.constant 0 : i32
    %c0_i32_1 = arith.constant 0 : i32
    return %c0_i32, %c0_i32_0 : i32, i32
  }
  func.func @transform_4(%arg0: i32) -> i32 {
    %c0_i32 = arith.constant 0 : i32
    %c0_i32_0 = arith.constant 0 : i32
    return %c0_i32 : i32
  }
  func.func @transform_5(%arg0: i32) -> (i32, i32) {
    %c0_i32 = arith.constant 0 : i32
    %c0_i32_0 = arith.constant 0 : i32
    return %c0_i32, %arg0 : i32, i32
  }
}

</mosaic_0001>

<bundles_post_ra>
// kernel: critic_forward.1
= control target key start
LH: loop header
LB: loop body
LE: loop exit
PB: predicated region body
PF: predicated region fallthrough
CT: control target
= control target key end

     0   :  { %v1075_v0 = vmov 0   ;;  %vm249_vm0 = vcmask 261120   ;;  %s1609_s2 = inlined_call_operand.vmem [shape: f32[256,1], index: 2, kind: input, shape index: {}]   ;;  %s1610_s0 = inlined_call_operand.vmem [shape: f32[32,128], index: 0, kind: input, shape index: {}]   ;;  %s1611_s1 = inlined_call_operand.vmem [shape: f32[256,32], index: 1, kind: input, shape index: {}]   ;;  %s1612_s3 = inlined_call_operand.vmem [shape: f32[256,1], index: 3, kind: input, shape index: {}]   ;;  %s1613_s4 = inlined_call_operand.<no memory space> [shape: f32[1], index: 4, kind: input, shape index: {}]   ;;  %s1614_s5 = inlined_call_operand.vmem [shape: f32[1,128], index: 5, kind: output, shape index: {}]  }
   0x1   :  { %1010 = vset.pattern.permute.xlu1 %v1075_v0  ;;  %1009 = vset.pattern.permute.xlu0 %v1075_v0  ;;  %v59_v1 = vld [vmem:[%s1609_s2 + $0x10] sm:$0xff]  ;;  %v57_v2 = vld [vmem:[%s1609_s2] sm:$0xff]  ;;  %v54_v4 = vld [vmem:[%s1610_s0 + $0x8] sm:$0xff] }
   0x2   :  { %v53_v3 = vld [vmem:[%s1610_s0] sm:$0xff]  ;;  %101 = vperm.xlu1 %1010, %v59_v1   ;;  %91 = vperm.xlu0 %1009, %v57_v2   ;;  %v55_v6 = vld [vmem:[%s1610_s0 + $0x10] sm:$0xff]  ;;  %v56_v7 = vld [vmem:[%s1610_s0 + $0x18] sm:$0xff] }
   0x3   :  { %v996_v5 = vpack.c.bf16 %v54_v4, %v53_v3  ;;  %v60_v8 = vld [vmem:[%s1609_s2 + $0x18] sm:$0xff]  ;;  %v58_v9 = vld [vmem:[%s1609_s2 + $0x8] sm:$0xff]  ;;  %v1000_v10 = vpack.c.bf16 %v56_v7, %v55_v6  ;;  %v21_v11 = vld [vmem:[%s1611_s1] sm:$0xff] }
   0x4   :  { %v37_v12 = vld [vmem:[%s1611_s1 + $0x80] sm:$0xff]  ;;  %v62_v13 = vld [vmem:[%s1609_s2 + $0x28] sm:$0xff]  ;;  %948 = vmatprep.mubr.msk.f32.mxu0 %vm249_vm0, %v21_v11  ;;  %v23_v17 = vld [vmem:[%s1611_s1 + $0x10] sm:$0xff] }
   0x5   :  { %997 = vmatprep.subr.bf16.mxu0 %v996_v5  ;;  %1004 = vmatprep.subr.bf16.mxu1 %v996_v5  ;;  %v61_v14 = vld [vmem:[%s1609_s2 + $0x20] sm:$0xff]  ;;  %v22_v15 = vld [vmem:[%s1611_s1 + $0x8] sm:$0xff]  ;;  %v39_v18 = vld [vmem:[%s1611_s1 + $0x90] sm:$0xff] }
   0x6   :  { %999 = vmatpush3.bf16.msra.mxu0 %v996_v5  ;;  %1006 = vmatpush3.bf16.msra.mxu1 %v996_v5  ;;  %v38_v16 = vld [vmem:[%s1611_s1 + $0x88] sm:$0xff]  ;;  %v64_v19 = vld [vmem:[%s1609_s2 + $0x38] sm:$0xff]  ;;  %v63_v20 = vld [vmem:[%s1609_s2 + $0x30] sm:$0xff] }
   0x7   :  { %106 = vperm.xlu1 %1010, %v60_v8   ;;  %96 = vperm.xlu0 %1009, %v58_v9   ;;  %v24_v21 = vld [vmem:[%s1611_s1 + $0x18] sm:$0xff]  ;;  %v25_v23 = vld [vmem:[%s1611_s1 + $0x20] sm:$0xff]  ;;  %v66_v25 = vld [vmem:[%s1609_s2 + $0x48] sm:$0xff] }
   0x8   :  { %1001 = vmatprep.subr.bf16.mxu0 %v1000_v10  ;;  %1005 = vmatprep.subr.bf16.mxu1 %v1000_v10  ;;  %v40_v22 = vld [vmem:[%s1611_s1 + $0x98] sm:$0xff]  ;;  %v41_v24 = vld [vmem:[%s1611_s1 + $0xa0] sm:$0xff]  ;;  %v26_v27 = vld [vmem:[%s1611_s1 + $0x28] sm:$0xff] }
   0x9   :  { %972 = vmatprep.mubr.msk.f32.mxu1 %vm249_vm0, %v37_v12  ;;  %v65_v26 = vld [vmem:[%s1609_s2 + $0x40] sm:$0xff]  ;;  %v42_v28 = vld [vmem:[%s1611_s1 + $0xa8] sm:$0xff]  ;;  %v27_v29 = vld [vmem:[%s1611_s1 + $0x30] sm:$0xff] }
   0xa   :  { %1003 = vmatpush3.bf16.msra.mxu0 %v1000_v10  ;;  %1007 = vmatpush3.bf16.msra.mxu1 %v1000_v10  ;;  %v43_v30 = vld [vmem:[%s1611_s1 + $0xb0] sm:$0xff]  ;;  %v68_v31 = vld [vmem:[%s1609_s2 + $0x58] sm:$0xff]  ;;  %v29_v35 = vld [vmem:[%s1611_s1 + $0x40] sm:$0xff] }
   0xb   :  { %116 = vperm.xlu1 %1010, %v62_v13   ;;  %111 = vperm.xlu0 %1009, %v61_v14   ;;  %v67_v32 = vld [vmem:[%s1609_s2 + $0x50] sm:$0xff]  ;;  %v28_v33 = vld [vmem:[%s1611_s1 + $0x38] sm:$0xff]  ;;  %v45_v36 = vld [vmem:[%s1611_s1 + $0xc0] sm:$0xff] }
   0xc   :  { %v44_v34 = vld [vmem:[%s1611_s1 + $0xb8] sm:$0xff]  ;;  %v70_v37 = vld [vmem:[%s1609_s2 + $0x68] sm:$0xff]  ;;  %v69_v38 = vld [vmem:[%s1609_s2 + $0x60] sm:$0xff] }
   0xd   :  { %949 = vmatmul.mubr.msk.f32.vlgmr.msra.gmra.mrb[0].mxu0 %vm249_vm0, %v22_v15  ;;  %973 = vmatmul.mubr.msk.f32.vlgmr.msra.gmra.mrb[0].mxu1 %vm249_vm0, %v38_v16  ;;  %v30_v39 = vld [vmem:[%s1611_s1 + $0x48] sm:$0xff]  ;;  %v31_v41 = vld [vmem:[%s1611_s1 + $0x50] sm:$0xff]  ;;  %v72_v43 = vld [vmem:[%s1609_s2 + $0x78] sm:$0xff] }
   0xe   :  { %951 = vmatprep.mubr.msk.f32.mxu0 %vm249_vm0, %v23_v17  ;;  %975 = vmatprep.mubr.msk.f32.mxu1 %vm249_vm0, %v39_v18  ;;  %v46_v40 = vld [vmem:[%s1611_s1 + $0xc8] sm:$0xff]  ;;  %v47_v42 = vld [vmem:[%s1611_s1 + $0xd0] sm:$0xff]  ;;  %v32_v45 = vld [vmem:[%s1611_s1 + $0x58] sm:$0xff] }
   0xf   :  { %126 = vperm.xlu1 %1010, %v64_v19   ;;  %121 = vperm.xlu0 %1009, %v63_v20   ;;  %v71_v44 = vld [vmem:[%s1609_s2 + $0x70] sm:$0xff]  ;;  %v48_v46 = vld [vmem:[%s1611_s1 + $0xd8] sm:$0xff]  ;;  %v33_v47 = vld [vmem:[%s1611_s1 + $0x60] sm:$0xff] }
  0x10   :  { %v49_v48 = vld [vmem:[%s1611_s1 + $0xe0] sm:$0xff]  ;;  %v74_v49 = vld [vmem:[%s1609_s2 + $0x88] sm:$0xff]  ;;  %v35_v53 = vld [vmem:[%s1611_s1 + $0x70] sm:$0xff] }
  0x11   :  { %952 = vmatmul.mubr.msk.f32.gmra.mrb[2].mxu0 %vm249_vm0, %v24_v21  ;;  %976 = vmatmul.mubr.msk.f32.gmra.mrb[2].mxu1 %vm249_vm0, %v40_v22  ;;  %v73_v50 = vld [vmem:[%s1609_s2 + $0x80] sm:$0xff]  ;;  %v34_v51 = vld [vmem:[%s1611_s1 + $0x68] sm:$0xff]  ;;  %v51_v54 = vld [vmem:[%s1611_s1 + $0xf0] sm:$0xff] }
  0x12   :  { %954 = vmatprep.mubr.msk.f32.mxu0 %vm249_vm0, %v25_v23  ;;  %978 = vmatprep.mubr.msk.f32.mxu1 %vm249_vm0, %v41_v24  ;;  %v50_v52 = vld [vmem:[%s1611_s1 + $0xe8] sm:$0xff]  ;;  %v76_v55 = vld [vmem:[%s1609_s2 + $0x98] sm:$0xff]  ;;  %v75_v56 = vld [vmem:[%s1609_s2 + $0x90] sm:$0xff] }
  0x13   :  { %136 = vperm.xlu1 %1010, %v66_v25   ;;  %131 = vperm.xlu0 %1009, %v65_v26   ;;  %v36_v57 = vld [vmem:[%s1611_s1 + $0x78] sm:$0xff]  ;;  %v78_v59 = vld [vmem:[%s1609_s2 + $0xa8] sm:$0xff]  ;;  %v77_v60 = vld [vmem:[%s1609_s2 + $0xa0] sm:$0xff] }
  0x14   :  { %v52_v58 = vld [vmem:[%s1611_s1 + $0xf8] sm:$0xff]  ;;  %v79_v62 = vld [vmem:[%s1609_s2 + $0xb0] sm:$0xff]  ;;  %v82_v63 = vld [vmem:[%s1609_s2 + $0xc8] sm:$0xff] }
  0x15   :  { %955 = vmatmul.mubr.msk.f32.gmra.mrb[4].mxu0 %vm249_vm0, %v26_v27  ;;  %979 = vmatmul.mubr.msk.f32.gmra.mrb[4].mxu1 %vm249_vm0, %v42_v28  ;;  %v80_v61 = vld [vmem:[%s1609_s2 + $0xb8] sm:$0xff]  ;;  %v81_v0 = vld [vmem:[%s1609_s2 + $0xc0] sm:$0xff]  ;;  %v83_v2 = vld [vmem:[%s1609_s2 + $0xd0] sm:$0xff] }
  0x16   :  { %957 = vmatprep.mubr.msk.f32.mxu0 %vm249_vm0, %v27_v29  ;;  %981 = vmatprep.mubr.msk.f32.mxu1 %vm249_vm0, %v43_v30  ;;  %v84_v1 = vld [vmem:[%s1609_s2 + $0xd8] sm:$0xff]  ;;  %v603_v3 = vld [vmem:[%s1612_s3] sm:$0xff]  ;;  %v605_v5 = vld [vmem:[%s1612_s3 + $0x10] sm:$0xff] }
  0x17   :  { %146 = vperm.xlu1 %1010, %v68_v31   ;;  %141 = vperm.xlu0 %1009, %v67_v32   ;;  %v85_v4 = vld [vmem:[%s1609_s2 + $0xe0] sm:$0xff]  ;;  %v604_v6 = vld [vmem:[%s1612_s3 + $0x8] sm:$0xff]  ;;  %v606_v8 = vld [vmem:[%s1612_s3 + $0x18] sm:$0xff] }
  0x18   :  { %v607_v7 = vld [vmem:[%s1612_s3 + $0x20] sm:$0xff]  ;;  %v609_v9 = vld [vmem:[%s1612_s3 + $0x30] sm:$0xff]  ;;  %v608_v10 = vld [vmem:[%s1612_s3 + $0x28] sm:$0xff] }
  0x19   :  { %958 = vmatmul.mubr.msk.f32.gmra.mrb[6].mxu0 %vm249_vm0, %v28_v33  ;;  %982 = vmatmul.mubr.msk.f32.gmra.mrb[6].mxu1 %vm249_vm0, %v44_v34  ;;  %v611_v11 = vld [vmem:[%s1612_s3 + $0x40] sm:$0xff]  ;;  %v610_v12 = vld [vmem:[%s1612_s3 + $0x38] sm:$0xff]  ;;  %v613_v13 = vld [vmem:[%s1612_s3 + $0x50] sm:$0xff] }
  0x1a   :  { %960 = vmatprep.mubr.msk.f32.mxu0 %vm249_vm0, %v29_v35  ;;  %984 = vmatprep.mubr.msk.f32.mxu1 %vm249_vm0, %v45_v36  ;;  %v612_v14 = vld [vmem:[%s1612_s3 + $0x48] sm:$0xff]  ;;  %v615_v15 = vld [vmem:[%s1612_s3 + $0x60] sm:$0xff]  ;;  %v614_v16 = vld [vmem:[%s1612_s3 + $0x58] sm:$0xff] }
  0x1b   :  { %156 = vperm.xlu1 %1010, %v70_v37   ;;  %151 = vperm.xlu0 %1009, %v69_v38   ;;  %v617_v17 = vld [vmem:[%s1612_s3 + $0x70] sm:$0xff]  ;;  %v616_v18 = vld [vmem:[%s1612_s3 + $0x68] sm:$0xff]  ;;  %v619_v19 = vld [vmem:[%s1612_s3 + $0x80] sm:$0xff] }
  0x1c   :  { %v618_v20 = vld [vmem:[%s1612_s3 + $0x78] sm:$0xff]  ;;  %v621_v21 = vld [vmem:[%s1612_s3 + $0x90] sm:$0xff]  ;;  %v620_v22 = vld [vmem:[%s1612_s3 + $0x88] sm:$0xff] }
  0x1d   :  { %961 = vmatmul.mubr.msk.f32.gmra.mrb[8].mxu0 %vm249_vm0, %v30_v39  ;;  %985 = vmatmul.mubr.msk.f32.gmra.mrb[8].mxu1 %vm249_vm0, %v46_v40  ;;  %v623_v23 = vld [vmem:[%s1612_s3 + $0xa0] sm:$0xff]  ;;  %v622_v24 = vld [vmem:[%s1612_s3 + $0x98] sm:$0xff]  ;;  %v625_v25 = vld [vmem:[%s1612_s3 + $0xb0] sm:$0xff] }
  0x1e   :  { %963 = vmatprep.mubr.msk.f32.mxu0 %vm249_vm0, %v31_v41  ;;  %987 = vmatprep.mubr.msk.f32.mxu1 %vm249_vm0, %v47_v42  ;;  %v624_v26 = vld [vmem:[%s1612_s3 + $0xa8] sm:$0xff]  ;;  %v626_v27 = vld [vmem:[%s1612_s3 + $0xb8] sm:$0xff]  ;;  %v627_v29 = vld [vmem:[%s1612_s3 + $0xc0] sm:$0xff] }
  0x1f   :  { %166 = vperm.xlu1 %1010, %v72_v43   ;;  %161 = vperm.xlu0 %1009, %v71_v44   ;;  %v86_v28 = vld [vmem:[%s1609_s2 + $0xe8] sm:$0xff]  ;;  %v87_v30 = vld [vmem:[%s1609_s2 + $0xf0] sm:$0xff]  ;;  %v88_v32 = vld [vmem:[%s1609_s2 + $0xf8] sm:$0xff] }
  0x20   :  { %v628_v31 = vld [vmem:[%s1612_s3 + $0xc8] sm:$0xff]  ;;  %v630_v33 = vld [vmem:[%s1612_s3 + $0xd8] sm:$0xff]  ;;  %v629_v34 = vld [vmem:[%s1612_s3 + $0xd0] sm:$0xff] }
  0x21   :  { %964 = vmatmul.mubr.msk.f32.gmra.mrb[10].mxu0 %vm249_vm0, %v32_v45  ;;  %988 = vmatmul.mubr.msk.f32.gmra.mrb[10].mxu1 %vm249_vm0, %v48_v46  ;;  %v632_v35 = vld [vmem:[%s1612_s3 + $0xe8] sm:$0xff]  ;;  %v631_v36 = vld [vmem:[%s1612_s3 + $0xe0] sm:$0xff]  ;;  %v634_v37 = vld [vmem:[%s1612_s3 + $0xf8] sm:$0xff] }
  0x22   :  { %966 = vmatprep.mubr.msk.f32.mxu0 %vm249_vm0, %v33_v47  ;;  %990 = vmatprep.mubr.msk.f32.mxu1 %vm249_vm0, %v49_v48  ;;  %v633_v38 = vld [vmem:[%s1612_s3 + $0xf0] sm:$0xff] }
  0x23   :  { %176 = vperm.xlu1 %1010, %v74_v49   ;;  %171 = vperm.xlu0 %1009, %v73_v50  }
  0x25   :  { %967 = vmatmul.mubr.msk.f32.gmra.mrb[12].mxu0 %vm249_vm0, %v34_v51  ;;  %991 = vmatmul.mubr.msk.f32.gmra.mrb[12].mxu1 %vm249_vm0, %v50_v52 }
  0x26   :  { %969 = vmatprep.mubr.msk.f32.mxu0 %vm249_vm0, %v35_v53  ;;  %993 = vmatprep.mubr.msk.f32.mxu1 %vm249_vm0, %v51_v54 }
  0x27   :  { %186 = vperm.xlu1 %1010, %v76_v55   ;;  %181 = vperm.xlu0 %1009, %v75_v56  }
  0x29   :  { %970 = vmatmul.mubr.msk.f32.gmra.mrb[14].mxu0 %vm249_vm0, %v36_v57  ;;  %994 = vmatmul.mubr.msk.f32.gmra.mrb[14].mxu1 %vm249_vm0, %v52_v58 }
  0x2b   :  { %196 = vperm.xlu1 %1010, %v78_v59   ;;  %191 = vperm.xlu0 %1009, %v77_v60  }
  0x2f   :  { %206 = vperm.xlu1 %1010, %v80_v61   ;;  %201 = vperm.xlu0 %1009, %v79_v62  }
  0x33   :  { %216 = vperm.xlu1 %1010, %v82_v63   ;;  %211 = vperm.xlu0 %1009, %v81_v0  }
  0x37   :  { %226 = vperm.xlu1 %1010, %v84_v1   ;;  %221 = vperm.xlu0 %1009, %v83_v2  }
  0x3b   :  { %637 = vperm.xlu1 %1010, %v603_v3   ;;  %231 = vperm.xlu0 %1009, %v85_v4  }
  0x3f   :  { %647 = vperm.xlu1 %1010, %v605_v5   ;;  %642 = vperm.xlu0 %1009, %v604_v6  }
  0x43   :  { %657 = vperm.xlu1 %1010, %v607_v7   ;;  %652 = vperm.xlu0 %1009, %v606_v8  }
  0x47   :  { %667 = vperm.xlu1 %1010, %v609_v9   ;;  %662 = vperm.xlu0 %1009, %v608_v10  }
  0x4b   :  { %677 = vperm.xlu1 %1010, %v611_v11   ;;  %672 = vperm.xlu0 %1009, %v610_v12  }
  0x4f   :  { %687 = vperm.xlu1 %1010, %v613_v13   ;;  %682 = vperm.xlu0 %1009, %v612_v14  }
  0x53   :  { %697 = vperm.xlu1 %1010, %v615_v15   ;;  %692 = vperm.xlu0 %1009, %v614_v16  }
  0x57   :  { %707 = vperm.xlu1 %1010, %v617_v17   ;;  %702 = vperm.xlu0 %1009, %v616_v18  }
  0x5b   :  { %717 = vperm.xlu1 %1010, %v619_v19   ;;  %712 = vperm.xlu0 %1009, %v618_v20  }
  0x5f   :  { %727 = vperm.xlu1 %1010, %v621_v21   ;;  %722 = vperm.xlu0 %1009, %v620_v22  }
  0x63   :  { %737 = vperm.xlu1 %1010, %v623_v23   ;;  %732 = vperm.xlu0 %1009, %v622_v24  }
  0x67   :  { %747 = vperm.xlu1 %1010, %v625_v25   ;;  %742 = vperm.xlu0 %1009, %v624_v26  }
  0x6b   :  { %752 = vperm.xlu1 %1010, %v626_v27   ;;  %236 = vperm.xlu0 %1009, %v86_v28  }
  0x6f   :  { %757 = vperm.xlu1 %1010, %v627_v29   ;;  %241 = vperm.xlu0 %1009, %v87_v30  }
  0x73   :  { %762 = vperm.xlu1 %1010, %v628_v31   ;;  %246 = vperm.xlu0 %1009, %v88_v32  }
  0x77   :  { %772 = vperm.xlu1 %1010, %v630_v33   ;;  %767 = vperm.xlu0 %1009, %v629_v34  }
  0x7b   :  { %782 = vperm.xlu1 %1010, %v632_v35   ;;  %777 = vperm.xlu0 %1009, %v631_v36  }
  0x7f   :  { %792 = vperm.xlu1 %1010, %v634_v37   ;;  %787 = vperm.xlu0 %1009, %v633_v38  }
  0x81   :  { %v102_v39 = vpop.permute.xlu1 %101  ;;  %v92_v40 = vpop.permute.xlu0 %91 }
  0x86   :  { %v107_v41 = vpop.permute.xlu1 %106  ;;  %v97_v42 = vpop.permute.xlu0 %96 }
  0x8a   :  { %v117_v43 = vpop.permute.xlu1 %116  ;;  %v112_v44 = vpop.permute.xlu0 %111 }
  0x8e   :  { %v1438_v45 = vpop.permute.xlu1 %126  ;;  %v1440_v46 = vpop.permute.xlu0 %121 }
  0x92   :  { %v1442_v47 = vpop.permute.xlu1 %136  ;;  %v1444_v48 = vpop.permute.xlu0 %131 }
  0x96   :  { %v1446_v49 = vpop.permute.xlu1 %146  ;;  %v1448_v50 = vpop.permute.xlu0 %141 }
  0x9a   :  { %v1450_v51 = vpop.permute.xlu1 %156  ;;  %v1452_v52 = vpop.permute.xlu0 %151 }
  0x9e   :  { %v1454_v53 = vpop.permute.xlu1 %166  ;;  %v1456_v54 = vpop.permute.xlu0 %161 }
  0xa2   :  { %v1458_v55 = vpop.permute.xlu1 %176  ;;  %v1460_v56 = vpop.permute.xlu0 %171 }
  0xa6   :  { %v1462_v57 = vpop.permute.xlu1 %186  ;;  %v1464_v58 = vpop.permute.xlu0 %181 }
  0xaa   :  { %v1466_v59 = vpop.permute.xlu1 %196  ;;  %v1468_v60 = vpop.permute.xlu0 %191 }
  0xae   :  { %v1470_v61 = vpop.permute.xlu1 %206  ;;  %v1472_v62 = vpop.permute.xlu0 %201 }
  0xb2   :  { %v1474_v63 = vpop.permute.xlu1 %216  ;;  %v1476_v0 = vpop.permute.xlu0 %211 }
  0xb6   :  { %v1478_v1 = vpop.permute.xlu1 %226  ;;  %v1480_v2 = vpop.permute.xlu0 %221 }
  0xba   :  { %v638_v3 = vpop.permute.xlu1 %637  ;;  %v1482_v4 = vpop.permute.xlu0 %231 }
  0xbe   :  { %v648_v5 = vpop.permute.xlu1 %647  ;;  %v643_v6 = vpop.permute.xlu0 %642 }
  0xc2   :  { %v1484_v7 = vpop.permute.xlu1 %657  ;;  %v1486_v8 = vpop.permute.xlu0 %652 }
  0xc6   :  { %v1488_v9 = vpop.permute.xlu1 %667  ;;  %v1490_v10 = vpop.permute.xlu0 %662 }
  0xca   :  { %v1492_v11 = vpop.permute.xlu1 %677  ;;  %v1494_v12 = vpop.permute.xlu0 %672 }
  0xce   :  { %v1496_v13 = vpop.permute.xlu1 %687  ;;  %v1498_v14 = vpop.permute.xlu0 %682 }
  0xd2   :  { %v1504_v21 = vpop.permute.xlu1 %697  ;;  %v1506_v22 = vpop.permute.xlu0 %692 }
  0xd6   :  { %v1516_v35 = vpop.permute.xlu1 %707  ;;  %v1518_v36 = vpop.permute.xlu0 %702 }
  0xe0   :  { %v950_v15 = vpop.f32.mrb[0].mxu0  ;;  %v1500_v16 = vpop.f32.mrb[0].mxu1 }
  0xe1   :  { %v418_v17 = vadd.f32 %v950_v15, %v97_v42  ;;  %v412_v18 = vpop.f32.mrb[1].mxu0  ;;  %v1502_v19 = vpop.f32.mrb[1].mxu1 }
  0xe2   :  { %v413_v20 = vadd.f32 %v412_v18, %v92_v40 }
  0xe3   :  { %1011 = vtanh.f32 %v418_v17 }
  0xe4   :  { %v953_v23 = vpop.f32.mrb[2].mxu0  ;;  %v1508_v24 = vpop.f32.mrb[2].mxu1  ;;  %1013 = vtanh.f32 %v413_v20 }
  0xe5   :  { %v428_v25 = vadd.f32 %v953_v23, %v107_v41  ;;  %v422_v26 = vpop.f32.mrb[3].mxu0  ;;  %v1510_v27 = vpop.f32.mrb[3].mxu1 }
  0xe6   :  { %v423_v28 = vadd.f32 %v422_v26, %v102_v39 }
  0xe7   :  { %1015 = vtanh.f32 %v428_v25 }
  0xe8   :  { %v956_v29 = vpop.f32.mrb[4].mxu0  ;;  %v1512_v30 = vpop.f32.mrb[4].mxu1  ;;  %1017 = vtanh.f32 %v423_v28 }
  0xe9   :  { %v438_v31 = vadd.f32 %v956_v29, %v117_v43  ;;  %v432_v32 = vpop.f32.mrb[5].mxu0  ;;  %v1514_v33 = vpop.f32.mrb[5].mxu1 }
  0xea   :  { %v433_v34 = vadd.f32 %v432_v32, %v112_v44 }
  0xeb   :  { %1019 = vtanh.f32 %v438_v31 }
  0xec   :  { %v959_v37 = vpop.f32.mrb[6].mxu0  ;;  %v1520_v38 = vpop.f32.mrb[6].mxu1  ;;  %1021 = vtanh.f32 %v433_v34 }
  0xed   :  { %v1012_v40 = vpop.eup %1011  ;;  %v448_v39 = vadd.f32 %v959_v37, %v1438_v45  ;;  %v442_v41 = vpop.f32.mrb[7].mxu0 }
  0xee   :  { %v1523_v42 = vpop.f32.mrb[7].mxu1  ;;  %v796_v43 = vmul.f32 %v1012_v40, %v643_v6  ;;  %v443_v15 = vadd.f32 %v442_v41, %v1440_v46  ;;  %v1014_v17 = vpop.eup %1013 }
  0xef   :  { %v795_v44 = vmul.f32 %v1014_v17, %v638_v3  ;;  %1023 = vtanh.f32 %v448_v39  ;;  %v1532_v6 = vpop.permute.xlu1 %717  ;;  %v1534_v46 = vpop.permute.xlu0 %712 }
  0xf0   :  { %v962_v18 = vpop.f32.mrb[8].mxu0  ;;  %v1526_v20 = vpop.f32.mrb[8].mxu1  ;;  %1025 = vtanh.f32 %v443_v15 }
  0xf1   :  { %v458_v23 = vadd.f32 %v962_v18, %v1442_v47  ;;  %v452_v25 = vpop.f32.mrb[9].mxu0  ;;  %v1529_v26 = vpop.f32.mrb[9].mxu1  ;;  %v827_v45 = vadd.f32 %v796_v43, %v795_v44 }
  0xf2   :  { %v1016_v28 = vpop.eup %1015  ;;  %v453_v29 = vadd.f32 %v452_v25, %v1444_v48 }
  0xf3   :  { %v1018_v31 = vpop.eup %1017  ;;  %1027 = vtanh.f32 %v458_v23  ;;  %v798_v41 = vmul.f32 %v1016_v28, %v1486_v8 }
  0xf4   :  { %v797_v3 = vmul.f32 %v1018_v31, %v648_v5  ;;  %v965_v32 = vpop.f32.mrb[10].mxu0  ;;  %v1536_v34 = vpop.f32.mrb[10].mxu1  ;;  %1029 = vtanh.f32 %v453_v29 }
  0xf5   :  { %v468_v47 = vadd.f32 %v965_v32, %v1446_v49  ;;  %v462_v37 = vpop.f32.mrb[11].mxu0  ;;  %v1539_v40 = vpop.f32.mrb[11].mxu1 }
  0xf6   :  { %v1020_v39 = vpop.eup %1019  ;;  %v828_v48 = vadd.f32 %v827_v45, %v797_v3  ;;  %v463_v43 = vadd.f32 %v462_v37, %v1448_v50  ;;  %v1551_v31 = vpop.permute.xlu1 %727 }
  0xf7   :  { %v1022_v15 = vpop.eup %1021  ;;  %1031 = vtanh.f32 %v468_v47  ;;  %v800_v8 = vmul.f32 %v1020_v39, %v1490_v10 }
  0xf8   :  { %v799_v17 = vmul.f32 %v1022_v15, %v1484_v7  ;;  %v829_v5 = vadd.f32 %v828_v48, %v798_v41  ;;  %v968_v44 = vpop.f32.mrb[12].mxu0  ;;  %v1544_v18 = vpop.f32.mrb[12].mxu1  ;;  %1033 = vtanh.f32 %v463_v43 }
  0xf9   :  { %v478_v49 = vadd.f32 %v968_v44, %v1450_v51  ;;  %v472_v23 = vpop.f32.mrb[13].mxu0  ;;  %v1547_v25 = vpop.f32.mrb[13].mxu1 }
  0xfa   :  { %v1024_v29 = vpop.eup %1023  ;;  %v830_v28 = vadd.f32 %v829_v5, %v799_v17  ;;  %v473_v50 = vadd.f32 %v472_v23, %v1452_v52  ;;  %v1553_v7 = vpop.permute.xlu0 %722 }
  0xfb   :  { %v1026_v45 = vpop.eup %1025  ;;  %1035 = vtanh.f32 %v478_v49  ;;  %v802_v52 = vmul.f32 %v1024_v29, %v1494_v12 }
  0xfc   :  { %v801_v3 = vmul.f32 %v1026_v45, %v1488_v9  ;;  %v831_v32 = vadd.f32 %v830_v28, %v800_v8  ;;  %v971_v47 = vpop.f32.mrb[14].mxu0  ;;  %v1556_v51 = vpop.f32.mrb[14].mxu1  ;;  %1037 = vtanh.f32 %v473_v50  ;;  %v493_v9 = vadd.f32 %v1502_v19, %v1460_v56 }
  0xfd   :  { %v488_v37 = vadd.f32 %v971_v47, %v1454_v53  ;;  %v482_v41 = vpop.f32.mrb[15].mxu0  ;;  %v1559_v10 = vpop.f32.mrb[15].mxu1  ;;  %v498_v53 = vadd.f32 %v1500_v16, %v1458_v55  ;;  %v503_v8 = vadd.f32 %v1510_v27, %v1464_v58  ;;  %v508_v19 = vadd.f32 %v1508_v24, %v1462_v57 }
  0xfe   :  { %v1028_v39 = vpop.eup %1027  ;;  %v832_v48 = vadd.f32 %v831_v32, %v801_v3  ;;  %v483_v43 = vadd.f32 %v482_v41, %v1456_v54  ;;  %v733_v44 = vpop.permute.xlu0 %732  ;;  %v513_v45 = vadd.f32 %v1514_v33, %v1468_v60  ;;  %v518_v27 = vadd.f32 %v1512_v30, %v1466_v59 }
  0xff   :  { %v1030_v15 = vpop.eup %1029  ;;  %1039 = vtanh.f32 %v488_v37  ;;  %v804_v23 = vmul.f32 %v1028_v39, %v1498_v14  ;;  %v738_v54 = vpop.permute.xlu1 %737  ;;  %v523_v47 = vadd.f32 %v1523_v42, %v1472_v62  ;;  %v528_v41 = vadd.f32 %v1520_v38, %v1470_v61 }
 0x100   :  { %v803_v17 = vmul.f32 %v1030_v15, %v1492_v11  ;;  %v833_v5 = vadd.f32 %v832_v48, %v802_v52  ;;  %1041 = vtanh.f32 %v483_v43  ;;  %v533_v52 = vadd.f32 %v1529_v26, %v1476_v0 }
 0x101   :  { %v1032_v49 = vpop.eup %1031  ;;  %1043 = vtanh.f32 %v493_v9  ;;  %v538_v48 = vadd.f32 %v1526_v20, %v1474_v63  ;;  %v543_v15 = vadd.f32 %v1539_v40, %v1480_v2 }
 0x102   :  { %v834_v12 = vadd.f32 %v833_v5, %v803_v17  ;;  %v1034_v29 = vpop.eup %1033  ;;  %1045 = vtanh.f32 %v498_v53  ;;  %v806_v16 = vmul.f32 %v1032_v49, %v1506_v22  ;;  %v743_v14 = vpop.permute.xlu0 %742  ;;  %v548_v17 = vadd.f32 %v1536_v34, %v1478_v1 }
 0x103   :  { %v805_v56 = vmul.f32 %v1034_v29, %v1496_v13  ;;  %1047 = vtanh.f32 %v503_v8  ;;  %v748_v13 = vpop.permute.xlu1 %747 }
 0x104   :  { %v835_v11 = vadd.f32 %v834_v12, %v804_v23  ;;  %1049 = vtanh.f32 %v508_v19 }
 0x105   :  { %v1036_v55 = vpop.eup %1035  ;;  %1051 = vtanh.f32 %v513_v45 }
 0x106   :  { %v836_v28 = vadd.f32 %v835_v11, %v805_v56  ;;  %v1038_v50 = vpop.eup %1037  ;;  %v808_v57 = vmul.f32 %v1036_v55, %v1518_v36  ;;  %1053 = vtanh.f32 %v518_v27 }
 0x107   :  { %v807_v3 = vmul.f32 %v1038_v50, %v1504_v21  ;;  %v237_v21 = vpop.permute.xlu0 %236  ;;  %v753_v36 = vpop.permute.xlu1 %752  ;;  %1055 = vtanh.f32 %v523_v47 }
 0x108   :  { %v837_v58 = vadd.f32 %v836_v28, %v806_v16  ;;  %1057 = vtanh.f32 %v528_v41  ;;  %v558_v40 = vadd.f32 %v1544_v18, %v237_v21 }
 0x109   :  { %v1040_v32 = vpop.eup %1039  ;;  %1059 = vtanh.f32 %v533_v52 }
 0x10a   :  { %v838_v24 = vadd.f32 %v837_v58, %v807_v3  ;;  %v1042_v22 = vpop.eup %1041  ;;  %v810_v59 = vmul.f32 %v1040_v32, %v1534_v46  ;;  %1061 = vtanh.f32 %v538_v48 }
 0x10b   :  { %v809_v37 = vmul.f32 %v1042_v22, %v1516_v35  ;;  %v1044_v33 = vpop.eup %1043  ;;  %v242_v46 = vpop.permute.xlu0 %241  ;;  %1063 = vtanh.f32 %v543_v15 }
 0x10c   :  { %v839_v60 = vadd.f32 %v838_v24, %v808_v57  ;;  %v1046_v39 = vpop.eup %1045  ;;  %v811_v62 = vmul.f32 %v1044_v33, %v1532_v6  ;;  %v758_v6 = vpop.permute.xlu1 %757  ;;  %1065 = vtanh.f32 %v548_v17  ;;  %v563_v1 = vadd.f32 %v1559_v10, %v242_v46 }
 0x10d   :  { %v1048_v35 = vpop.eup %1047  ;;  %v812_v43 = vmul.f32 %v1046_v39, %v1553_v7  ;;  %v553_v7 = vadd.f32 %v1547_v25, %v1482_v4 }
 0x10e   :  { %v840_v30 = vadd.f32 %v839_v60, %v809_v37  ;;  %v1050_v38 = vpop.eup %1049  ;;  %v813_v9 = vmul.f32 %v1048_v35, %v1551_v31 }
 0x10f   :  { %v1052_v26 = vpop.eup %1051  ;;  %v814_v5 = vmul.f32 %v1050_v38, %v733_v44  ;;  %v247_v2 = vpop.permute.xlu0 %246  ;;  %1067 = vtanh.f32 %v553_v7 }
 0x110   :  { %v841_v42 = vadd.f32 %v840_v30, %v810_v59  ;;  %v1054_v20 = vpop.eup %1053  ;;  %v815_v53 = vmul.f32 %v1052_v26, %v738_v54  ;;  %v763_v8 = vpop.permute.xlu1 %762  ;;  %1069 = vtanh.f32 %v558_v40  ;;  %v568_v4 = vadd.f32 %v1556_v51, %v247_v2 }
 0x111   :  { %v1056_v23 = vpop.eup %1055  ;;  %v816_v31 = vmul.f32 %v1054_v20, %v743_v14  ;;  %1071 = vtanh.f32 %v563_v1 }
 0x112   :  { %v842_v61 = vadd.f32 %v841_v42, %v811_v62  ;;  %v1058_v29 = vpop.eup %1057  ;;  %v817_v34 = vmul.f32 %v1056_v23, %v748_v13  ;;  %1073 = vtanh.f32 %v568_v4 }
 0x113   :  { %v1060_v56 = vpop.eup %1059  ;;  %v818_v25 = vmul.f32 %v1058_v29, %v753_v36  ;;  %v768_v19 = vpop.permute.xlu0 %767 }
 0x114   :  { %v843_v0 = vadd.f32 %v842_v61, %v812_v43  ;;  %v1062_v11 = vpop.eup %1061  ;;  %v819_v55 = vmul.f32 %v1060_v56, %v758_v6  ;;  %v773_v28 = vpop.permute.xlu1 %772  ;;  %v865_v61 = vstv %s1613_s4 }
 0x115   :  { %v1064_v16 = vpop.eup %1063  ;;  %v820_v50 = vmul.f32 %v1062_v11, %v763_v8 }
 0x116   :  { %v844_v63 = vadd.f32 %v843_v0, %v813_v9  ;;  %v1066_v45 = vpop.eup %1065  ;;  %v821_v10 = vmul.f32 %v1064_v16, %v768_v19 }
 0x117   :  { %v778_v13 = vpop.permute.xlu0 %777  ;;  %v822_v27 = vmul.f32 %v1066_v45, %v773_v28 }
 0x118   :  { %v845_v49 = vadd.f32 %v844_v63, %v814_v5  ;;  %v783_v57 = vpop.permute.xlu1 %782 }
 0x119   :  { %v1068_v58 = vpop.eup %1067 }
 0x11a   :  { %v846_v12 = vadd.f32 %v845_v49, %v815_v53  ;;  %v1070_v51 = vpop.eup %1069  ;;  %v823_v24 = vmul.f32 %v1068_v58, %v778_v13 }
 0x11b   :  { %v1072_v47 = vpop.eup %1071  ;;  %v824_v37 = vmul.f32 %v1070_v51, %v783_v57  ;;  %v788_v21 = vpop.permute.xlu0 %787 }
 0x11c   :  { %v847_v44 = vadd.f32 %v846_v12, %v816_v31  ;;  %v1074_v33 = vpop.eup %1073  ;;  %v825_v41 = vmul.f32 %v1072_v47, %v788_v21  ;;  %v793_v30 = vpop.permute.xlu1 %792 }
 0x11d   :  { %v826_v39 = vmul.f32 %v1074_v33, %v793_v30 }
 0x11e   :  { %v848_v54 = vadd.f32 %v847_v44, %v817_v34 }
 0x120   :  { %v849_v18 = vadd.f32 %v848_v54, %v818_v25 }
 0x122   :  { %v850_v14 = vadd.f32 %v849_v18, %v819_v55 }
 0x124   :  { %v851_v3 = vadd.f32 %v850_v14, %v820_v50 }
 0x126   :  { %v852_v32 = vadd.f32 %v851_v3, %v821_v10 }
 0x128   :  { %v853_v22 = vadd.f32 %v852_v32, %v822_v27 }
 0x12a   :  { %v854_v60 = vadd.f32 %v853_v22, %v823_v24 }
 0x12c   :  { %v855_v59 = vadd.f32 %v854_v60, %v824_v37 }
 0x12e   :  { %v856_v36 = vadd.f32 %v855_v59, %v825_v41 }
 0x130   :  { %v857_v52 = vadd.f32 %v856_v36, %v826_v39 }
 0x132   :  { %v858_v62 = vrot.slane %v857_v52, 4 }
 0x134   :  { %v859_v42 = vadd.f32 %v858_v62, %v857_v52 }
 0x136   :  { %v860_v35 = vrot.slane %v859_v42, 2 }
 0x138   :  { %v861_v48 = vadd.f32 %v860_v35, %v859_v42 }
 0x13a   :  { %v862_v43 = vrot.slane %v861_v48, 1 }
 0x13c   :  { %v863_v38 = vadd.f32 %v862_v43, %v861_v48 }
 0x13e   :  { %v866_v46 = vadd.f32 %v865_v61, %v863_v38 }
 0x140   :  { %867 = vst [vmem:[%s1614_s5] sm:$0x1] %v866_v46 }

</bundles_post_ra>
